<compile_context>
chip_gen: v5e
topology: v5e:2x2
jax: 0.10.0
libtpu: 0.0.40
codegen_flags: <defaults>
</compile_context>

<pallas_src>
import jax
import jax.numpy as jnp
from jax.experimental import pallas as pl
from jax.experimental.pallas import tpu as pltpu


# ------------------------------ fused kernel -------------------------------

def make_fused_kernel(conv_meta, n_fc, B, slab, WG):
    """conv_meta: tuple of (KH, KW, pad, Cin, Cout); slab = lane-aligned HG*WG."""
    n_conv = len(conv_meta)
    L = B * slab                                   # lanes per grid step

    def kernel(*refs):
        it = 0
        x_ref = refs[it]; it += 1
        mask_ref = refs[it]; it += 1
        sel_ref = refs[it]; it += 1
        conv_w = refs[it:it + n_conv]; it += n_conv
        conv_b = refs[it:it + n_conv]; it += n_conv
        fc_w = refs[it:it + n_fc]; it += n_fc
        fc_b = refs[it:it + n_fc]; it += n_fc
        o_ref = refs[it]

        halo_mask = mask_ref[...]                  # (1, L): 1 on each image interior
        act = x_ref[0]                             # (Cin0, L), spatial-on-lanes, f32

        # ------------------------- ConvStack -------------------------------
        for l, (KH, KW, p, Cin, Cout) in enumerate(conv_meta):
            # zero-extend along lanes so every tap is a cheap static lane slice
            ext_lo = p * WG + p
            ext_hi = (KH - 1 - p) * WG + (KW - 1 - p)
            ext = jnp.concatenate(
                [jnp.zeros((Cin, ext_lo), jnp.float32), act,
                 jnp.zeros((Cin, ext_hi), jnp.float32)], axis=1)
            # tiny in-VMEM im2col: KH*KW lane-shifted copies stacked on sublanes
            taps = []
            for kh in range(KH):
                for kw in range(KW):
                    off = kh * WG + kw             # == ext_lo + (kh-p)*WG + (kw-p)
                    taps.append(ext[:, off:off + L])
            patches = jnp.concatenate(taps, axis=0)            # (KH*KW*Cin, L)
            # one MXU pass per layer: (Cout, KH*KW*Cin) @ (KH*KW*Cin, L)
            acc = jnp.dot(conv_w[l][...], patches,
                          preferred_element_type=jnp.float32)
            act = jnp.maximum(acc + conv_b[l][...], 0.0)       # bias + ReLU, (Cout, L)
            if l < n_conv - 1:
                act = act * halo_mask              # re-zero halo = next layer's padding

        # ------------------ SpatialReduce('mean') + MLPTrunk ---------------
        # sel (B, L) holds 1/(H*W) on each image's interior: one A @ B^T matmul
        # = per-image masked mean -> (B, C_last).  float cast / flatten are no-ops.
        feat = jax.lax.dot_general(sel_ref[...], act, (((1,), (1,)), ((), ())),
                                   preferred_element_type=jnp.float32)
        for j in range(n_fc):                      # MLP: Linear -> ReLU
            feat = jnp.maximum(
                jnp.dot(feat, fc_w[j][...], preferred_element_type=jnp.float32)
                + fc_b[j][...], 0.0)

        o_ref[0] = feat.astype(o_ref.dtype)        # single (B, F) HBM write per step

    return kernel


def _full_block_spec(shape):
    nd = len(shape)
    return pl.BlockSpec(shape, lambda n: (0,) * nd)


# --------------------------------- forward ---------------------------------

def forward(x_nchw, conv_params, conv_strides, conv_paddings, fc_params,
            images_per_step=None):
    x = x_nchw.astype(jnp.float32)
    N, C0, H, W = x.shape

    conv_meta, conv_w_k, conv_b_k = [], [], []
    cin = C0
    for (w, b), s, p in zip(conv_params, conv_strides, conv_paddings):
        cout, cin_w, KH, KW = w.shape
        assert cin_w == cin
        # TODO(synk): generalize the flat-lane conv to stride>1 / non-'same' padding.
        assert s == 1 and KH == 2 * p + 1 and KW == 2 * p + 1, \
            "fused kernel supports stride-1 'same' convolutions"
        conv_meta.append((KH, KW, p, cin, cout))
        # (O,I,KH,KW) -> (O, KH*KW*I), matching the in-kernel patches row order
        conv_w_k.append(jnp.transpose(w, (0, 2, 3, 1))
                        .reshape(cout, KH * KW * cin).astype(jnp.float32))
        conv_b_k.append(b.reshape(cout, 1).astype(jnp.float32))
        cin = cout

    fc_w_k = [w.astype(jnp.float32) for (w, _) in fc_params]        # (in, out)
    fc_b_k = [b.reshape(1, -1).astype(jnp.float32) for (_, b) in fc_params]
    F = fc_w_k[-1].shape[1]

    # common padded grid shared by every conv layer ('same' convs keep HxW fixed)
    P = max(conv_paddings)
    HG, WG = H + 2 * P, W + 2 * P
    slab = ((HG * WG + 127) // 128) * 128        # lane-align each image's flat slab

    # images per grid step: fills the FC matmul M dim and amortizes per-step
    # overhead.  (On v7x with large N, pass images_per_step=N//2 so both
    # TensorCores get grid steps; the grid dim is marked "parallel".)
    if images_per_step is None:
        images_per_step = min(N, 8)
    B = max(1, int(images_per_step))
    nb = -(-N // B)
    Npad = nb * B
    L = B * slab

    # layout plumbing (all outside the kernel): pad batch, pad spatial by P,
    # flatten spatial, lane-align the slab, group B images per block on lanes.
    xb = jnp.pad(x, ((0, Npad - N), (0, 0), (0, 0), (0, 0)))
    xp = jnp.pad(xb, ((0, 0), (0, 0), (P, P), (P, P)))               # (Npad,C0,HG,WG)
    xf = jnp.pad(xp.reshape(Npad, C0, HG * WG),
                 ((0, 0), (0, 0), (0, slab - HG * WG)))              # (Npad,C0,slab)
    xg = xf.reshape(nb, B, C0, slab).transpose(0, 2, 1, 3).reshape(nb, C0, L)

    # (1, L) interior mask and (B, L) per-image mean selector
    interior = jnp.zeros((HG, WG), jnp.float32).at[P:P + H, P:P + W].set(1.0)
    slab_mask = jnp.pad(interior.reshape(1, HG * WG),
                        ((0, 0), (0, slab - HG * WG)))               # (1, slab)
    halo_mask = jnp.tile(slab_mask, (1, B))                          # (1, L)
    sel = jnp.kron(jnp.eye(B, dtype=jnp.float32), slab_mask) / float(H * W)  # (B, L)

    in_specs = [pl.BlockSpec((1, C0, L), lambda n: (n, 0, 0)),
                _full_block_spec(halo_mask.shape),
                _full_block_spec(sel.shape)]
    in_specs += [_full_block_spec(a.shape) for a in conv_w_k]
    in_specs += [_full_block_spec(a.shape) for a in conv_b_k]
    in_specs += [_full_block_spec(a.shape) for a in fc_w_k]
    in_specs += [_full_block_spec(a.shape) for a in fc_b_k]

    out = pl.pallas_call(
        make_fused_kernel(tuple(conv_meta), len(fc_params), B, slab, WG),
        out_shape=jax.ShapeDtypeStruct((nb, B, F), jnp.float32),
        grid=(nb,),
        in_specs=in_specs,
        out_specs=pl.BlockSpec((1, B, F), lambda n: (n, 0, 0)),
        compiler_params=pltpu.CompilerParams(
            dimension_semantics=("parallel",)),
    )(xg, halo_mask, sel, *conv_w_k, *conv_b_k, *fc_w_k, *fc_b_k)

    return out.reshape(Npad, F)[:N]


# ----------------------------- pure-JAX reference --------------------------

def ref_forward(x_nchw, conv_params, conv_strides, conv_paddings, fc_params):
    y = x_nchw.astype(jnp.float32)
    for (w, b), s, p in zip(conv_params, conv_strides, conv_paddings):
        y = jax.lax.conv_general_dilated(
            y, w, (s, s), [(p, p), (p, p)],
            dimension_numbers=('NCHW', 'OIHW', 'NCHW'))
        y = jnp.maximum(y + b[None, :, None, None], 0.0)
    y = jnp.mean(y, axis=(2, 3))
    for (w, b) in fc_params:
        y = jnp.maximum(y @ w + b, 0.0)
    return y


# ----------------------------------- main -----------------------------------

if __name__ == "__main__":
    # Module config (small, consistent with the forward pass)
    input_shape = (4, 16, 16)          # (C, H, W)
    conv_out_cs = [8, 16]
    conv_filter_sizes = [3, 3]
    conv_paddings = [1, 1]
    conv_strides = [1, 1]
    fc_hidden_sizes = [32, 32]
    batch = 2                          # activation = ReLU, reduction = 'mean'

    key = jax.random.PRNGKey(0)
    keys = iter(jax.random.split(key, 16))

    x = jax.random.normal(next(keys), (batch,) + input_shape, dtype=jnp.float32)

    # Deterministic parameters (PyTorch shapes: conv OIHW, linear (in, out))
    conv_params = []
    cin = input_shape[0]
    for cout, ks in zip(conv_out_cs, conv_filter_sizes):
        w = 0.1 * jax.random.normal(next(keys), (cout, cin, ks, ks), jnp.float32)
        b = 0.1 * jax.random.normal(next(keys), (cout,), jnp.float32)
        conv_params.append((w, b))
        cin = cout

    fc_params = []
    fin = conv_out_cs[-1]
    for h in fc_hidden_sizes:
        w = 0.1 * jax.random.normal(next(keys), (fin, h), jnp.float32)
        b = 0.1 * jax.random.normal(next(keys), (h,), jnp.float32)
        fc_params.append((w, b))
        fin = h

    out = forward(x, conv_params, conv_strides, conv_paddings, fc_params)
    out = jax.block_until_ready(out)

    ref = ref_forward(x, conv_params, conv_strides, conv_paddings, fc_params)
    assert out.shape == (batch, fc_hidden_sizes[-1]), out.shape
    assert jnp.allclose(out, ref, atol=1e-4, rtol=1e-4), \
        float(jnp.max(jnp.abs(out - ref)))
    print("KERNEL_OK")
</pallas_src>

<mosaic_0001>
module attributes {stable_mosaic.version = 11 : i64} {
  func.func @kernel(%arg0: i32, %arg1: memref<1x4x768xf32, #tpu.memory_space<vmem>>, %arg2: memref<1x768xf32, #tpu.memory_space<vmem>>, %arg3: memref<2x768xf32, #tpu.memory_space<vmem>>, %arg4: memref<8x36xf32, #tpu.memory_space<vmem>>, %arg5: memref<16x72xf32, #tpu.memory_space<vmem>>, %arg6: memref<8x1xf32, #tpu.memory_space<vmem>>, %arg7: memref<16x1xf32, #tpu.memory_space<vmem>>, %arg8: memref<16x32xf32, #tpu.memory_space<vmem>>, %arg9: memref<32x32xf32, #tpu.memory_space<vmem>>, %arg10: memref<1x32xf32, #tpu.memory_space<vmem>>, %arg11: memref<1x32xf32, #tpu.memory_space<vmem>>, %arg12: memref<1x2x32xf32, #tpu.memory_space<vmem>>) attributes {dimension_semantics = [#tpu.dimension_semantics<parallel>], iteration_bounds = array<i64: 1>, scalar_prefetch = 0 : i64, scratch_operands = 0 : i64, tpu.core_type = #tpu.core_type<tc>, window_params = [{transform_indices = @transform_0, window_bounds = array<i64: 1, 4, 768>}, {pipeline_mode = #tpu.pipeline_mode<synchronous>, transform_indices = @transform_1, window_bounds = array<i64: 1, 768>}, {pipeline_mode = #tpu.pipeline_mode<synchronous>, transform_indices = @transform_2, window_bounds = array<i64: 2, 768>}, {pipeline_mode = #tpu.pipeline_mode<synchronous>, transform_indices = @transform_3, window_bounds = array<i64: 8, 36>}, {pipeline_mode = #tpu.pipeline_mode<synchronous>, transform_indices = @transform_4, window_bounds = array<i64: 16, 72>}, {pipeline_mode = #tpu.pipeline_mode<synchronous>, transform_indices = @transform_5, window_bounds = array<i64: 8, 1>}, {pipeline_mode = #tpu.pipeline_mode<synchronous>, transform_indices = @transform_6, window_bounds = array<i64: 16, 1>}, {pipeline_mode = #tpu.pipeline_mode<synchronous>, transform_indices = @transform_7, window_bounds = array<i64: 16, 32>}, {pipeline_mode = #tpu.pipeline_mode<synchronous>, transform_indices = @transform_8, window_bounds = array<i64: 32, 32>}, {pipeline_mode = #tpu.pipeline_mode<synchronous>, transform_indices = @transform_9, window_bounds = array<i64: 1, 32>}, {pipeline_mode = #tpu.pipeline_mode<synchronous>, transform_indices = @transform_10, window_bounds = array<i64: 1, 32>}, {transform_indices = @transform_11, window_bounds = array<i64: 1, 2, 32>}]} {
    %c0 = arith.constant 0 : index
    %c0_0 = arith.constant 0 : index
    %0 = vector.load %arg2[%c0, %c0_0] : memref<1x768xf32, #tpu.memory_space<vmem>>, vector<1x768xf32>
    %c0_1 = arith.constant 0 : index
    %c0_2 = arith.constant 0 : index
    %c0_3 = arith.constant 0 : index
    %1 = vector.load %arg1[%c0_1, %c0_2, %c0_3] : memref<1x4x768xf32, #tpu.memory_space<vmem>>, vector<1x4x768xf32>
    %2 = vector.shape_cast %1 : vector<1x4x768xf32> to vector<4x768xf32>
    %cst = arith.constant 0.000000e+00 : f32
    %3 = vector.broadcast %cst : f32 to vector<4x19xf32>
    %cst_4 = arith.constant 0.000000e+00 : f32
    %4 = vector.broadcast %cst_4 : f32 to vector<4x19xf32>
    %5 = tpu.concatenate %3, %2, %4 in 1 : vector<4x19xf32>, vector<4x768xf32>, vector<4x19xf32> -> vector<4x806xf32>
    %6 = vector.extract_strided_slice %5 {offsets = [0, 0], sizes = [4, 768], strides = [1, 1]} : vector<4x806xf32> to vector<4x768xf32>
    %7 = vector.extract_strided_slice %5 {offsets = [0, 1], sizes = [4, 768], strides = [1, 1]} : vector<4x806xf32> to vector<4x768xf32>
    %8 = vector.extract_strided_slice %5 {offsets = [0, 2], sizes = [4, 768], strides = [1, 1]} : vector<4x806xf32> to vector<4x768xf32>
    %9 = vector.extract_strided_slice %5 {offsets = [0, 18], sizes = [4, 768], strides = [1, 1]} : vector<4x806xf32> to vector<4x768xf32>
    %10 = vector.extract_strided_slice %5 {offsets = [0, 19], sizes = [4, 768], strides = [1, 1]} : vector<4x806xf32> to vector<4x768xf32>
    %11 = vector.extract_strided_slice %5 {offsets = [0, 20], sizes = [4, 768], strides = [1, 1]} : vector<4x806xf32> to vector<4x768xf32>
    %12 = vector.extract_strided_slice %5 {offsets = [0, 36], sizes = [4, 768], strides = [1, 1]} : vector<4x806xf32> to vector<4x768xf32>
    %13 = vector.extract_strided_slice %5 {offsets = [0, 37], sizes = [4, 768], strides = [1, 1]} : vector<4x806xf32> to vector<4x768xf32>
    %14 = vector.extract_strided_slice %5 {offsets = [0, 38], sizes = [4, 768], strides = [1, 1]} : vector<4x806xf32> to vector<4x768xf32>
    %15 = tpu.concatenate %6, %7, %8, %9, %10, %11, %12, %13, %14 in 0 : vector<4x768xf32>, vector<4x768xf32>, vector<4x768xf32>, vector<4x768xf32>, vector<4x768xf32>, vector<4x768xf32>, vector<4x768xf32>, vector<4x768xf32>, vector<4x768xf32> -> vector<36x768xf32>
    %c0_5 = arith.constant 0 : index
    %c0_6 = arith.constant 0 : index
    %16 = vector.load %arg4[%c0_5, %c0_6] : memref<8x36xf32, #tpu.memory_space<vmem>>, vector<8x36xf32>
    %cst_7 = arith.constant dense<0.000000e+00> : vector<8x768xf32>
    %17 = tpu.matmul %16, %15, %cst_7 {dimension_numbers = #tpu.dot_dimension_numbers<[1], [0], [0], [1], [0, 0, 1, 1], [], []>} : vector<8x36xf32>, vector<36x768xf32>, vector<8x768xf32> -> vector<8x768xf32>
    %c0_8 = arith.constant 0 : index
    %c0_9 = arith.constant 0 : index
    %18 = vector.load %arg6[%c0_8, %c0_9] : memref<8x1xf32, #tpu.memory_space<vmem>>, vector<8x1xf32>
    %19 = vector.broadcast %18 : vector<8x1xf32> to vector<8x768xf32>
    %20 = arith.addf %17, %19 : vector<8x768xf32>
    %cst_10 = arith.constant 0.000000e+00 : f32
    %21 = vector.broadcast %cst_10 : f32 to vector<8x768xf32>
    %22 = arith.maximumf %20, %21 : vector<8x768xf32>
    %23 = vector.broadcast %0 : vector<1x768xf32> to vector<8x768xf32>
    %24 = arith.mulf %22, %23 : vector<8x768xf32>
    %cst_11 = arith.constant 0.000000e+00 : f32
    %25 = vector.broadcast %cst_11 : f32 to vector<8x19xf32>
    %cst_12 = arith.constant 0.000000e+00 : f32
    %26 = vector.broadcast %cst_12 : f32 to vector<8x19xf32>
    %27 = tpu.concatenate %25, %24, %26 in 1 : vector<8x19xf32>, vector<8x768xf32>, vector<8x19xf32> -> vector<8x806xf32>
    %28 = vector.extract_strided_slice %27 {offsets = [0, 0], sizes = [8, 768], strides = [1, 1]} : vector<8x806xf32> to vector<8x768xf32>
    %29 = vector.extract_strided_slice %27 {offsets = [0, 1], sizes = [8, 768], strides = [1, 1]} : vector<8x806xf32> to vector<8x768xf32>
    %30 = vector.extract_strided_slice %27 {offsets = [0, 2], sizes = [8, 768], strides = [1, 1]} : vector<8x806xf32> to vector<8x768xf32>
    %31 = vector.extract_strided_slice %27 {offsets = [0, 18], sizes = [8, 768], strides = [1, 1]} : vector<8x806xf32> to vector<8x768xf32>
    %32 = vector.extract_strided_slice %27 {offsets = [0, 19], sizes = [8, 768], strides = [1, 1]} : vector<8x806xf32> to vector<8x768xf32>
    %33 = vector.extract_strided_slice %27 {offsets = [0, 20], sizes = [8, 768], strides = [1, 1]} : vector<8x806xf32> to vector<8x768xf32>
    %34 = vector.extract_strided_slice %27 {offsets = [0, 36], sizes = [8, 768], strides = [1, 1]} : vector<8x806xf32> to vector<8x768xf32>
    %35 = vector.extract_strided_slice %27 {offsets = [0, 37], sizes = [8, 768], strides = [1, 1]} : vector<8x806xf32> to vector<8x768xf32>
    %36 = vector.extract_strided_slice %27 {offsets = [0, 38], sizes = [8, 768], strides = [1, 1]} : vector<8x806xf32> to vector<8x768xf32>
    %37 = tpu.concatenate %28, %29, %30, %31, %32, %33, %34, %35, %36 in 0 : vector<8x768xf32>, vector<8x768xf32>, vector<8x768xf32>, vector<8x768xf32>, vector<8x768xf32>, vector<8x768xf32>, vector<8x768xf32>, vector<8x768xf32>, vector<8x768xf32> -> vector<72x768xf32>
    %c0_13 = arith.constant 0 : index
    %c0_14 = arith.constant 0 : index
    %38 = vector.load %arg5[%c0_13, %c0_14] : memref<16x72xf32, #tpu.memory_space<vmem>>, vector<16x72xf32>
    %cst_15 = arith.constant dense<0.000000e+00> : vector<16x768xf32>
    %39 = tpu.matmul %38, %37, %cst_15 {dimension_numbers = #tpu.dot_dimension_numbers<[1], [0], [0], [1], [0, 0, 1, 1], [], []>} : vector<16x72xf32>, vector<72x768xf32>, vector<16x768xf32> -> vector<16x768xf32>
    %c0_16 = arith.constant 0 : index
    %c0_17 = arith.constant 0 : index
    %40 = vector.load %arg7[%c0_16, %c0_17] : memref<16x1xf32, #tpu.memory_space<vmem>>, vector<16x1xf32>
    %41 = vector.broadcast %40 : vector<16x1xf32> to vector<16x768xf32>
    %42 = arith.addf %39, %41 : vector<16x768xf32>
    %cst_18 = arith.constant 0.000000e+00 : f32
    %43 = vector.broadcast %cst_18 : f32 to vector<16x768xf32>
    %44 = arith.maximumf %42, %43 : vector<16x768xf32>
    %c0_19 = arith.constant 0 : index
    %c0_20 = arith.constant 0 : index
    %45 = vector.load %arg3[%c0_19, %c0_20] : memref<2x768xf32, #tpu.memory_space<vmem>>, vector<2x768xf32>
    %cst_21 = arith.constant dense<0.000000e+00> : vector<2x16xf32>
    %46 = tpu.matmul %45, %44, %cst_21 {dimension_numbers = #tpu.dot_dimension_numbers<[1], [1], [0], [0], [0, 0, 1, 0], [], []>} : vector<2x768xf32>, vector<16x768xf32>, vector<2x16xf32> -> vector<2x16xf32>
    %c0_22 = arith.constant 0 : index
    %c0_23 = arith.constant 0 : index
    %47 = vector.load %arg8[%c0_22, %c0_23] : memref<16x32xf32, #tpu.memory_space<vmem>>, vector<16x32xf32>
    %cst_24 = arith.constant dense<0.000000e+00> : vector<2x32xf32>
    %48 = tpu.matmul %46, %47, %cst_24 {dimension_numbers = #tpu.dot_dimension_numbers<[1], [0], [0], [1], [0, 0, 1, 1], [], []>} : vector<2x16xf32>, vector<16x32xf32>, vector<2x32xf32> -> vector<2x32xf32>
    %c0_25 = arith.constant 0 : index
    %c0_26 = arith.constant 0 : index
    %49 = vector.load %arg10[%c0_25, %c0_26] : memref<1x32xf32, #tpu.memory_space<vmem>>, vector<1x32xf32>
    %50 = vector.broadcast %49 : vector<1x32xf32> to vector<2x32xf32>
    %51 = arith.addf %48, %50 : vector<2x32xf32>
    %cst_27 = arith.constant 0.000000e+00 : f32
    %52 = vector.broadcast %cst_27 : f32 to vector<2x32xf32>
    %53 = arith.maximumf %51, %52 : vector<2x32xf32>
    %c0_28 = arith.constant 0 : index
    %c0_29 = arith.constant 0 : index
    %54 = vector.load %arg9[%c0_28, %c0_29] : memref<32x32xf32, #tpu.memory_space<vmem>>, vector<32x32xf32>
    %cst_30 = arith.constant dense<0.000000e+00> : vector<2x32xf32>
    %55 = tpu.matmul %53, %54, %cst_30 {dimension_numbers = #tpu.dot_dimension_numbers<[1], [0], [0], [1], [0, 0, 1, 1], [], []>} : vector<2x32xf32>, vector<32x32xf32>, vector<2x32xf32> -> vector<2x32xf32>
    %c0_31 = arith.constant 0 : index
    %c0_32 = arith.constant 0 : index
    %56 = vector.load %arg11[%c0_31, %c0_32] : memref<1x32xf32, #tpu.memory_space<vmem>>, vector<1x32xf32>
    %57 = vector.broadcast %56 : vector<1x32xf32> to vector<2x32xf32>
    %58 = arith.addf %55, %57 : vector<2x32xf32>
    %cst_33 = arith.constant 0.000000e+00 : f32
    %59 = vector.broadcast %cst_33 : f32 to vector<2x32xf32>
    %60 = arith.maximumf %58, %59 : vector<2x32xf32>
    %c0_34 = arith.constant 0 : index
    %c0_35 = arith.constant 0 : index
    %c0_36 = arith.constant 0 : index
    %61 = vector.load %arg12[%c0_34, %c0_35, %c0_36] : memref<1x2x32xf32, #tpu.memory_space<vmem>>, vector<1x2x32xf32>
    %62 = vector.shape_cast %61 : vector<1x2x32xf32> to vector<2x32xf32>
    %63 = vector.shape_cast %60 : vector<2x32xf32> to vector<1x2x32xf32>
    tpu.vector_store %arg12[%c0_34, %c0_35, %c0_36], %63 {strides = array<i32>} : memref<1x2x32xf32, #tpu.memory_space<vmem>>, vector<1x2x32xf32>,
    return
  }
  func.func @transform_0(%arg0: i32) -> (i32, i32, i32) {
    %c0_i32 = arith.constant 0 : i32
    %c0_i32_0 = arith.constant 0 : i32
    %c0_i32_1 = arith.constant 0 : i32
    return %arg0, %c0_i32, %c0_i32_0 : i32, i32, i32
  }
  func.func @transform_1(%arg0: i32) -> (i32, i32) {
    %c0_i32 = arith.constant 0 : i32
    %c0_i32_0 = arith.constant 0 : i32
    %c0_i32_1 = arith.constant 0 : i32
    return %c0_i32, %c0_i32_0 : i32, i32
  }
  func.func @transform_2(%arg0: i32) -> (i32, i32) {
    %c0_i32 = arith.constant 0 : i32
    %c0_i32_0 = arith.constant 0 : i32
    %c0_i32_1 = arith.constant 0 : i32
    return %c0_i32, %c0_i32_0 : i32, i32
  }
  func.func @transform_3(%arg0: i32) -> (i32, i32) {
    %c0_i32 = arith.constant 0 : i32
    %c0_i32_0 = arith.constant 0 : i32
    %c0_i32_1 = arith.constant 0 : i32
    return %c0_i32, %c0_i32_0 : i32, i32
  }
  func.func @transform_4(%arg0: i32) -> (i32, i32) {
    %c0_i32 = arith.constant 0 : i32
    %c0_i32_0 = arith.constant 0 : i32
    %c0_i32_1 = arith.constant 0 : i32
    return %c0_i32, %c0_i32_0 : i32, i32
  }
  func.func @transform_5(%arg0: i32) -> (i32, i32) {
    %c0_i32 = arith.constant 0 : i32
    %c0_i32_0 = arith.constant 0 : i32
    %c0_i32_1 = arith.constant 0 : i32
    return %c0_i32, %c0_i32_0 : i32, i32
  }
  func.func @transform_6(%arg0: i32) -> (i32, i32) {
    %c0_i32 = arith.constant 0 : i32
    %c0_i32_0 = arith.constant 0 : i32
    %c0_i32_1 = arith.constant 0 : i32
    return %c0_i32, %c0_i32_0 : i32, i32
  }
  func.func @transform_7(%arg0: i32) -> (i32, i32) {
    %c0_i32 = arith.constant 0 : i32
    %c0_i32_0 = arith.constant 0 : i32
    %c0_i32_1 = arith.constant 0 : i32
    return %c0_i32, %c0_i32_0 : i32, i32
  }
  func.func @transform_8(%arg0: i32) -> (i32, i32) {
    %c0_i32 = arith.constant 0 : i32
    %c0_i32_0 = arith.constant 0 : i32
    %c0_i32_1 = arith.constant 0 : i32
    return %c0_i32, %c0_i32_0 : i32, i32
  }
  func.func @transform_9(%arg0: i32) -> (i32, i32) {
    %c0_i32 = arith.constant 0 : i32
    %c0_i32_0 = arith.constant 0 : i32
    %c0_i32_1 = arith.constant 0 : i32
    return %c0_i32, %c0_i32_0 : i32, i32
  }
  func.func @transform_10(%arg0: i32) -> (i32, i32) {
    %c0_i32 = arith.constant 0 : i32
    %c0_i32_0 = arith.constant 0 : i32
    %c0_i32_1 = arith.constant 0 : i32
    return %c0_i32, %c0_i32_0 : i32, i32
  }
  func.func @transform_11(%arg0: i32) -> (i32, i32, i32) {
    %c0_i32 = arith.constant 0 : i32
    %c0_i32_0 = arith.constant 0 : i32
    %c0_i32_1 = arith.constant 0 : i32
    return %arg0, %c0_i32, %c0_i32_0 : i32, i32, i32
  }
}

</mosaic_0001>

<bundles_post_ra>
// kernel: tpu_custom_call.1
= control target key start
LH: loop header
LB: loop body
LE: loop exit
PB: predicated region body
PF: predicated region fallthrough
CT: control target
= control target key end

     0   :  { %16 = vsyncpa [#allocation3], 0  ;;  %s2348_s0 = inlined_call_operand.vmem [shape: f32[1,4,768], index: 0, kind: input, shape index: {}]   ;;  %s2349_s1 = inlined_call_operand.hbm [shape: f32[1,768], index: 1, kind: input, shape index: {}]   ;;  %s2350_s2 = inlined_call_operand.hbm [shape: f32[2,768], index: 2, kind: input, shape index: {}]   ;;  %s2351_s3 = inlined_call_operand.hbm [shape: f32[8,36], index: 3, kind: input, shape index: {}]   ;;  %s2352_s4 = inlined_call_operand.hbm [shape: f32[16,72], index: 4, kind: input, shape index: {}]   ;;  %s2353_s5 = inlined_call_operand.vmem [shape: f32[8,1], index: 5, kind: input, shape index: {}]   ;;  %s2354_s6 = inlined_call_operand.vmem [shape: f32[16,1], index: 6, kind: input, shape index: {}]   ;;  %s2355_s7 = inlined_call_operand.hbm [shape: f32[16,32], index: 7, kind: input, shape index: {}]   ;;  %s2356_s8 = inlined_call_operand.hbm [shape: f32[32,32], index: 8, kind: input, shape index: {}]   ;;  %s2357_s9 = inlined_call_operand.vmem [shape: f32[1,32], index: 9, kind: input, shape index: {}]   ;;  %s2358_s10 = inlined_call_operand.vmem [shape: f32[1,32], index: 10, kind: input, shape index: {}]   ;;  %s2359_s11 = inlined_call_operand.hbm [shape: f32[1,2,32], index: 11, kind: output, shape index: {}]  }
   0x1   :  { %17 = vsyncpa [#allocation6], 0 }
   0x2   :  { %18 = vsyncpa [#allocation9], 0 }
   0x3   :  { %19 = vsyncpa [#allocation12], 0  ;;  %s39_s19 = sshll.u32 %s2350_s2, 4  ;;  %s40_s19 = int_to_ptr.hbm [resolvable:$true] %s39_s19 }
   0x4   :  { %20 = vsyncpa [#allocation4], 0  ;;  %s1687_s20 = smov [#allocation5]   ;;  %s60_s24 = sshll.u32 %s2352_s4, 4  ;;  %s61_s24 = int_to_ptr.hbm [resolvable:$true] %s60_s24 }
   0x5   :  { %s41_s21 = sshll.u32 %s1687_s20, 4  ;;  %s1688_s25 = smov [#allocation8]   ;;  %s42_s21 = int_to_ptr.vmem [resolvable:$true] %s41_s21 }
   0x6   :  { %44 = dma.hbm_to_vmem [thread:$0]  %s40_s19, 192, %s42_s21, [#allocation6]  }
   0x7   :  { %s62_s26 = sshll.u32 %s1688_s25, 4  ;;  %s1689_s27 = smov 128   ;;  %s63_s26 = int_to_ptr.vmem [resolvable:$true] %s62_s26 }
   0x8   :  { %s1690_s28 = smov 8   ;;  %s28_s2 = sshll.u32 %s2349_s1, 4  ;;  %s29_s2 = int_to_ptr.hbm [resolvable:$true] %s28_s2 }
   0x9   :  { %68 = dma.hbm_to_vmem [thread:$0]  %s61_s24, 256, %s63_s26, [#allocation9], %s1689_s27, %s1689_s27, %s1690_s28  }
   0xa   :  { %s1691_s12 = smov [#allocation2]   ;;  %s50_s4 = sshll.u32 %s2351_s3, 4  ;;  %s51_s4 = int_to_ptr.hbm [resolvable:$true] %s50_s4 }
   0xb   :  { %s30_s13 = sshll.u32 %s1691_s12, 4  ;;  %s1692_s16 = smov [#allocation7]   ;;  %s31_s13 = int_to_ptr.vmem [resolvable:$true] %s30_s13 }
   0xc   :  { %33 = dma.hbm_to_vmem [thread:$0]  %s29_s2, 96, %s31_s13, [#allocation3]  }
   0xd   :  { %s52_s17 = sshll.u32 %s1692_s16, 4  ;;  %s77_s20 = sshll.u32 %s2355_s7, 4  ;;  %s53_s17 = int_to_ptr.vmem [resolvable:$true] %s52_s17  ;;  %s78_s20 = int_to_ptr.hbm [resolvable:$true] %s77_s20 }
   0xe   :  { %55 = dma.hbm_to_vmem [thread:$0]  %s51_s4, 128, %s53_s17, [#allocation6]  }
   0xf   :  { %s90_s22 = sshll.u32 %s2356_s8, 4  ;;  %s1693_s23 = smov [#allocation10]   ;;  %s91_s22 = int_to_ptr.hbm [resolvable:$true] %s90_s22 }
  0x10   :  { %s79_s24 = sshll.u32 %s1693_s23, 4  ;;  %s1694_s3 = smov [#allocation11]   ;;  %s80_s24 = int_to_ptr.vmem [resolvable:$true] %s79_s24 }
  0x11   :  { %85 = dma.hbm_to_vmem [thread:$0]  %s78_s20, 256, %s80_s24, [#allocation9], %s1689_s27, %s1689_s27, %s1690_s28  }
  0x12   :  { %s92_s25 = sshll.u32 %s1694_s3, 4  ;;  %s93_s25 = int_to_ptr.vmem [resolvable:$true] %s92_s25 }
  0x13   :  { %98 = dma.hbm_to_vmem [thread:$0]  %s91_s22, 512, %s93_s25, [#allocation12], %s1689_s27, %s1689_s27, %s1690_s28  }
  0x14   :  { %1677 = dma.done.wait [#allocation3], 96  }
  0x15   :  { %1678 = vsyncadd [#allocation3], 4294967200 }
  0x16   :  { %1679 = dma.done.wait [#allocation6], 320  }
  0x17   :  { %1680 = vsyncadd [#allocation6], 4294966976 }
  0x18   :  { %1681 = dma.done.wait [#allocation9], 512  }
  0x19   :  { %1682 = vsyncadd [#allocation9], 4294966784 }
  0x1a   :  { %1683 = dma.done.wait [#allocation12], 512  }
  0x1b   :  { %1684 = vsyncadd [#allocation12], 4294966784  ;;  %v129_v0 = vld [vmem:[%s2348_s0 + $0x8] sm:$0xff]  ;;  %v128_v1 = vld [vmem:[%s2348_s0] sm:$0xff]  ;;  %s1695_s27 = smov 19   ;;  %vm157_vm0 = vcmask 154624  }
  0x1c   :  { %136 = vst [vmem:[#allocation1 + $0x10] ss:$2 sm:$0xff] %v129_v0  ;;  %v130_v2 = vld [vmem:[%s2348_s0 + $0x10] sm:$0xff]  ;;  %s1696_s0 = smov 90   ;;  %s1697_s28 = smov 92   ;;  %vm222_vm1 = vcmask 1031168   ;;  %vm1234_vm11 = vmneg %vm157_vm0 }
  0x1d   :  { %134 = vst [vmem:[#allocation1] ss:$2 sm:$0xff] %v128_v1  ;;  %v997_v3 = vld [vmem:[#allocation5] sm:$0xff]  ;;  %v998_v4 = vld [vmem:[#allocation5 + $0x8] sm:$0xf]  ;;  %s1698_s12 = smov 109  }
  0x1e   :  { %138 = vst [vmem:[#allocation1 + $0x20] ss:$2 sm:$0xff] %v130_v2  ;;  %s1699_s13 = smov 126   ;;  %s1700_s14 = smov 108   ;;  %vm384_vm2 = vcmask 736256   ;;  %vm391_vm3 = vcmask 1043456  }
  0x1f   :  { %s1701_s15 = smov 91   ;;  %s1702_s4 = smov 110   ;;  %vm357_vm4 = vcmask 744448   ;;  %vm330_vm5 = vcmask 752640   ;;  %vm276_vm6 = vcmask 891904   ;;  %vm303_vm7 = vcmask 883712  }
  0x20   :  { %s1703_s16 = smov 127   ;;  %vm249_vm8 = vcmask 900096   ;;  %vm195_vm9 = vcmask 1039360   ;;  %vm423_vm10 = vcmask 293888   ;;  %vm840_vm12 = vcmask 588800   ;;  %s1705_s24 = smov [#allocation13]  }
  0x21   :  { %vm1142_vm13 = vcmask 130048   ;;  %vm1175_vm14 = vcmask 261120   ;;  %s1207_s3 = sshll.u32 %s1705_s24, 4  ;;  %s1209_s26 = sshll.u32 %s2359_s11, 4  ;;  %vm1200_vm15 = vcmask 254976   ;;  %s1208_s3 = int_to_ptr.vmem [resolvable:$true] %s1207_s3  ;;  %s1210_s26 = int_to_ptr.hbm [resolvable:$true] %s1209_s26 }
  0x23   :  { %v142_v5 = vld.sshfl [vmem:[#allocation1 + $0x18] sm:$0xff pattern:$0x75316420]  ;;  %v141_v6 = vld.sshfl [vmem:[#allocation1 + $0x10] sm:$0xff pattern:$0x75316420] }
  0x24   :  { %151 = vrot.lane.b32.xlu1 %v142_v5, %s1695_s27  ;;  %v140_v7 = vld.sshfl [vmem:[#allocation1 + $0x8] sm:$0xff pattern:$0x75316420]  ;;  %v139_v8 = vld.sshfl [vmem:[#allocation1] sm:$0xff pattern:$0x75316420] }
  0x25   :  { %147 = vrot.lane.b32.xlu0 %v140_v7, %s1695_s27  ;;  %1001 = vst [vmem:[#allocation1] ss:$4 sm:$0xff] %v997_v3  ;;  %v143_v9 = vld.sshfl [vmem:[#allocation1 + $0x20] sm:$0xff pattern:$0x75316420] }
  0x26   :  { %153 = vrot.lane.b32.xlu2 %v143_v9, %s1695_s27  ;;  %v144_v10 = vld.sshfl [vmem:[#allocation1 + $0x28] sm:$0xff pattern:$0x75316420] }
  0x27   :  { %1003 = vst [vmem:[#allocation1 + $0x20] ss:$4 sm:$0xff] %v998_v4 }
  0x2c   :  { %145 = vrot.lane.b32.xlu1 %v139_v8, %s1695_s27 }
  0x2d   :  { %149 = vrot.lane.b32.xlu0 %v141_v6, %s1695_s27 }
  0x2e   :  { %155 = vrot.lane.b32.xlu2 %v144_v10, %s1695_s27 }
  0x80   :  { %v154_v16 = vpop.permute.xlu2 %153 }
  0x88   :  { %v156_v20 = vpop.permute.xlu2 %155 }
  0x89   :  { %v1826_v23 = vsel %vm157_vm0, %v154_v16, %v156_v20  ;;  %v171_v26 = vsel %vm157_vm0, %v156_v20, 0.0 }
  0x8a   :  { %v179_v34 = vrot.slane %v1826_v23, 4  ;;  %v180_v36 = vrot.slane %v171_v26, 4 }
  0x8c   :  { %v1369_v37 = vpack.i.bf16 %v180_v36, %v179_v34 }
  0x96   :  { %v152_v12 = vpop.permute.xlu1 %151 }
  0x97   :  { %v148_v11 = vpop.permute.xlu0 %147  ;;  %v1823_v22 = vsel %vm157_vm0, %v152_v12, %v154_v16 }
  0x98   :  { %v1309_v25 = vpack.i.bf16 %v1826_v23, %v1823_v22  ;;  %v178_v33 = vrot.slane %v1823_v22, 4 }
  0x9a   :  { %v1354_v35 = vpack.i.bf16 %v179_v34, %v178_v33 }
  0x9e   :  { %v146_v18 = vpop.permute.xlu1 %145 }
  0x9f   :  { %v150_v13 = vpop.permute.xlu0 %149  ;;  %v1813_v19 = vsel %vm157_vm0, 0.0, %v146_v18  ;;  %v1820_v21 = vsel %vm157_vm0, %v146_v18, %v148_v11 }
  0xa0   :  { %v1800_v14 = vsel %vm157_vm0, %v148_v11, %v150_v13  ;;  %v1803_v15 = vsel %vm157_vm0, %v150_v13, %v152_v12  ;;  %v1294_v24 = vpack.i.bf16 %v1820_v21, %v1813_v19  ;;  %v174_v30 = vrot.slane %v1813_v19, 4 }
  0xa1   :  { %374 = vrot.lane.b32.xlu0 %v1800_v14, %s1696_s0  ;;  %376 = vrot.lane.b32.xlu1 %v1803_v15, %s1696_s0  ;;  %v1269_v17 = vpack.i.bf16 %v1803_v15, %v1800_v14  ;;  %v176_v27 = vrot.slane %v1800_v14, 4  ;;  %v177_v28 = vrot.slane %v1803_v15, 4  ;;  %v175_v31 = vrot.slane %v1820_v21, 4 }
  0xa3   :  { %1270 = vrot.lane.b32.xlu2 %v1269_v17, %s1697_s28  ;;  %v1319_v29 = vpack.i.bf16 %v177_v28, %v176_v27  ;;  %v1329_v32 = vpack.i.bf16 %v175_v31, %v174_v30 }
  0xa9   :  { %1275 = vrot.lane.b32.xlu1 %v1269_v17, %s1698_s12  ;;  %370 = vrot.lane.b32.xlu0 %v1813_v19, %s1696_s0 }
  0xab   :  { %1280 = vrot.lane.b32.xlu2 %v1269_v17, %s1699_s13 }
  0xb1   :  { %1295 = vrot.lane.b32.xlu0 %v1294_v24, %s1699_s13  ;;  %372 = vrot.lane.b32.xlu1 %v1820_v21, %s1696_s0 }
  0xb3   :  { %1310 = vrot.lane.b32.xlu2 %v1309_v25, %s1699_s13 }
  0xb9   :  { %378 = vrot.lane.b32.xlu0 %v1823_v22, %s1696_s0  ;;  %1285 = vrot.lane.b32.xlu1 %v1294_v24, %s1697_s28 }
  0xbb   :  { %382 = vrot.lane.b32.xlu2 %v171_v26, %s1696_s0 }
  0xc1   :  { %1305 = vrot.lane.b32.xlu0 %v1309_v25, %s1698_s12  ;;  %1290 = vrot.lane.b32.xlu1 %v1294_v24, %s1698_s12 }
  0xc3   :  { %1320 = vrot.lane.b32.xlu2 %v1319_v29, %s1700_s14 }
  0xc9   :  { %274 = vrot.lane.b32.xlu0 %v171_v26, %s1698_s12  ;;  %1300 = vrot.lane.b32.xlu1 %v1309_v25, %s1697_s28 }
  0xcb   :  { %1330 = vrot.lane.b32.xlu2 %v1329_v32, %s1701_s15 }
  0xd1   :  { %1315 = vrot.lane.b32.xlu0 %v1319_v29, %s1701_s15  ;;  %380 = vrot.lane.b32.xlu1 %v1826_v23, %s1696_s0 }
  0xd3   :  { %1340 = vrot.lane.b32.xlu2 %v1329_v32, %s1700_s14 }
  0xd9   :  { %1325 = vrot.lane.b32.xlu0 %v1319_v29, %s1702_s4  ;;  %328 = vrot.lane.b32.xlu1 %v171_v26, %s1697_s28 }
  0xdb   :  { %1350 = vrot.lane.b32.xlu2 %v1329_v32, %s1703_s16 }
  0xe1   :  { %1335 = vrot.lane.b32.xlu0 %v1319_v29, %s1703_s16  ;;  %1345 = vrot.lane.b32.xlu1 %v1329_v32, %s1702_s4 }
  0xe3   :  { %1355 = vrot.lane.b32.xlu2 %v1354_v35, %s1701_s15 }
  0xe9   :  { %1365 = vrot.lane.b32.xlu0 %v1354_v35, %s1702_s4  ;;  %1360 = vrot.lane.b32.xlu1 %v1354_v35, %s1700_s14 }
  0xeb   :  { %355 = vrot.lane.b32.xlu2 %v180_v36, %s1701_s15 }
  0xf1   :  { %189 = vrot.lane.b32.xlu0 %v178_v33, %s1703_s16  ;;  %301 = vrot.lane.b32.xlu1 %v180_v36, %s1700_s14 }
  0xf3   :  { %220 = vrot.lane.b32.xlu2 %v171_v26, %s1699_s13 }
  0xf9   :  { %247 = vrot.lane.b32.xlu0 %v180_v36, %s1702_s4  ;;  %1370 = vrot.lane.b32.xlu1 %v1369_v37, %s1703_s16 }
  0xfd   :  { %v1871_v38 = vpop.permute.xlu2 %1270 }
  0xfe   :  { %v1273_v17 = vunpack.i.h.bf16 %v1871_v38  ;;  %v1272_v18 = vunpack.i.l.bf16 %v1871_v38 }
 0x100   :  { %v333_v35 = vsel %vm330_vm5, %v1272_v18, %v1273_v17 }
 0x105   :  { %v1873_v39 = vpop.permute.xlu2 %1280 }
 0x106   :  { %v1283_v41 = vunpack.i.h.bf16 %v1873_v39 }
 0x10d   :  { %v1875_v40 = vpop.permute.xlu2 %1310 }
 0x10e   :  { %v1312_v42 = vunpack.i.l.bf16 %v1875_v40 }
 0x110   :  { %v1884_v43 = vsel %vm222_vm1, %v1283_v41, %v1312_v42 }
 0x113   :  { %v375_v44 = vpop.permute.xlu0 %374  ;;  %v377_v45 = vpop.permute.xlu1 %376 }
 0x114   :  { %v387_v46 = vsel %vm384_vm2, %v375_v44, %v377_v45 }
 0x115   :  { %v1887_v47 = vpop.permute.xlu2 %382  ;;  %1226 = vmatpush.msk.msra.mxu2 %vm391_vm3, %v387_v46 }
 0x11b   :  { %v371_v48 = vpop.permute.xlu0 %370  ;;  %v1890_v49 = vpop.permute.xlu1 %1275 }
 0x11c   :  { %v1277_v27 = vunpack.i.l.bf16 %v1890_v49  ;;  %v1278_v30 = vunpack.i.h.bf16 %v1890_v49 }
 0x11d   :  { %v1892_v50 = vpop.permute.xlu2 %1320 }
 0x11e   :  { %v1323_v20 = vunpack.i.h.bf16 %v1892_v50  ;;  %v1322_v24 = vunpack.i.l.bf16 %v1892_v50 }
 0x120   :  { %v306_v37 = vsel %vm303_vm7, %v1322_v24, %v1323_v20 }
 0x123   :  { %v1894_v51 = vpop.permute.xlu0 %1295  ;;  %v373_v52 = vpop.permute.xlu1 %372 }
 0x124   :  { %v385_v53 = vsel %vm384_vm2, %v371_v48, %v373_v52  ;;  %v386_v54 = vsel %vm384_vm2, %v373_v52, %v375_v44 }
 0x125   :  { %v1331_v55 = vpop.permute.xlu2 %1330  ;;  %1222 = vmatpush.msk.msra.mxu0 %vm391_vm3, %v385_v53  ;;  %1224 = vmatpush.msk.msra.mxu1 %vm391_vm3, %v386_v54 }
 0x126   :  { %v1333_v56 = vunpack.i.h.bf16 %v1331_v55  ;;  %v1332_v57 = vunpack.i.l.bf16 %v1331_v55  ;;  %v279_v55 = vsel %vm276_vm6, %v1277_v27, %v1278_v30 }
 0x128   :  { %v358_v1 = vsel %vm357_vm4, %v1332_v57, %v1333_v56  ;;  %v406_v57 = vsel %vm391_vm3, %v279_v55, %v306_v37 }
 0x12b   :  { %v1900_v58 = vpop.permute.xlu0 %378  ;;  %v1286_v59 = vpop.permute.xlu1 %1285 }
 0x12c   :  { %v1288_v60 = vunpack.i.h.bf16 %v1286_v59  ;;  %v1287_v61 = vunpack.i.l.bf16 %v1286_v59  ;;  %v388_v62 = vsel %vm384_vm2, %v377_v45, %v1900_v58  ;;  %v1282_v59 = vunpack.i.l.bf16 %v1873_v39  ;;  %v417_v39 = vld [vmem:[%s2353_s5] sm:$0xff] }
 0x12d   :  { %v1341_v63 = vpop.permute.xlu2 %1340  ;;  %1228 = vmatpush.msk.msra.mxu3 %vm391_vm3, %v388_v62 }
 0x12e   :  { %v331_v0 = vsel %vm330_vm5, %v1287_v61, %v1288_v60  ;;  %v1343_v3 = vunpack.i.h.bf16 %v1341_v63  ;;  %v1342_v4 = vunpack.i.l.bf16 %v1341_v63  ;;  %v332_v34 = vsel %vm330_vm5, %v1288_v60, %v1272_v18 }
 0x12f   :  { %v410_v2 = vsel %vm391_vm3, %v331_v0, %v358_v1  ;;  %v225_v0 = vsel %vm222_vm1, %v1282_v59, %v1283_v41  ;;  %v1704_v41 = vmov 0  }
 0x130   :  { %451 = vmatpush.msra.mxu0 %v410_v2  ;;  %v304_v10 = vsel %vm303_vm7, %v1342_v4, %v1343_v3  ;;  %v305_v54 = vsel %vm303_vm7, %v1343_v3, %v1322_v24  ;;  %v1298_v3 = vunpack.i.h.bf16 %v1894_v51  ;;  %v1297_v4 = vunpack.i.l.bf16 %v1894_v51  ;;  %1374 = vset.pattern.permute.xlu2 %v1704_v41 }
 0x131   :  { %1505 = vset.pattern.permute.xlu0 %v1704_v41  ;;  %420 = vperm.xlu2 %1374, %v417_v39  }
 0x132   :  { %1506 = vset.pattern.permute.xlu1 %v1704_v41  ;;  %v223_v24 = vsel %vm222_vm1, %v1297_v4, %v1298_v3 }
 0x133   :  { %v1908_v5 = vpop.permute.xlu0 %1305  ;;  %v1291_v6 = vpop.permute.xlu1 %1290 }
 0x134   :  { %v1293_v7 = vunpack.i.h.bf16 %v1291_v6  ;;  %v1292_v8 = vunpack.i.l.bf16 %v1291_v6 }
 0x135   :  { %v1912_v11 = vpop.permute.xlu2 %1350 }
 0x136   :  { %v277_v9 = vsel %vm276_vm6, %v1292_v8, %v1293_v7  ;;  %v278_v36 = vsel %vm276_vm6, %v1293_v7, %v1277_v27  ;;  %v1353_v6 = vunpack.i.h.bf16 %v1912_v11  ;;  %v1352_v7 = vunpack.i.l.bf16 %v1912_v11 }
 0x137   :  { %v404_v12 = vsel %vm391_vm3, %v277_v9, %v304_v10  ;;  %v224_v27 = vsel %vm222_vm1, %v1298_v3, %v1282_v59 }
 0x138   :  { %452 = vmatpush.msra.mxu0 %v404_v12 }
 0x13b   :  { %v1915_v13 = vpop.permute.xlu0 %274  ;;  %v1917_v16 = vpop.permute.xlu1 %1300 }
 0x13c   :  { %v1302_v26 = vunpack.i.l.bf16 %v1917_v16  ;;  %v1303_v18 = vunpack.i.h.bf16 %v1917_v16 }
 0x13d   :  { %v1923_v25 = vpop.permute.xlu2 %1355 }
 0x13e   :  { %v1357_v31 = vunpack.i.l.bf16 %v1923_v25  ;;  %v334_v45 = vsel %vm330_vm5, %v1273_v17, %v1302_v26  ;;  %v1358_v8 = vunpack.i.h.bf16 %v1923_v25 }
 0x143   :  { %v1316_v28 = vpop.permute.xlu0 %1315  ;;  %v1927_v29 = vpop.permute.xlu1 %380 }
 0x144   :  { %v1318_v32 = vunpack.i.h.bf16 %v1316_v28  ;;  %v1317_v33 = vunpack.i.l.bf16 %v1316_v28  ;;  %v196_v28 = vsel %vm195_vm9, %v1352_v7, %v1353_v6  ;;  %v390_v55 = vsel %vm384_vm2, %v1927_v29, %v1887_v47 }
 0x146   :  { %v359_v38 = vsel %vm357_vm4, %v1333_v56, %v1317_v33  ;;  %v360_v44 = vsel %vm357_vm4, %v1317_v33, %v1318_v32  ;;  %v361_v46 = vsel %vm357_vm4, %v1318_v32, %v1357_v31  ;;  %v405_v56 = vsel %vm391_vm3, %v278_v36, %v305_v54 }
 0x147   :  { %v411_v48 = vsel %vm391_vm3, %v332_v34, %v359_v38  ;;  %v412_v52 = vsel %vm391_vm3, %v333_v35, %v360_v44  ;;  %v413_v53 = vsel %vm391_vm3, %v334_v45, %v361_v46  ;;  %v1991_v38 = vld [vmem:[#allocation7] sm:$0xff]  ;;  %v356_v45 = vpop.permute.xlu2 %355  ;;  %v362_v46 = vsel %vm357_vm4, %v1357_v31, %v1358_v8 }
 0x148   :  { %471 = vmatpush.msra.mxu1 %v411_v48  ;;  %491 = vmatpush.msra.mxu2 %v412_v52  ;;  %v1308_v48 = vunpack.i.h.bf16 %v1908_v5  ;;  %v1307_v52 = vunpack.i.l.bf16 %v1908_v5  ;;  %v389_v5 = vsel %vm384_vm2, %v1900_v58, %v1927_v29  ;;  %v1313_v31 = vunpack.i.h.bf16 %v1875_v40 }
 0x149   :  { %511 = vmatpush.msra.mxu3 %v413_v53  ;;  %v392_v53 = vsel %vm391_vm3, %v1813_v19, %v196_v28  ;;  %v363_v19 = vsel %vm357_vm4, %v1358_v8, %v356_v45 }
 0x14a   :  { %472 = vmatpush.msra.mxu1 %v405_v56  ;;  %492 = vmatpush.msra.mxu2 %v406_v57  ;;  %v280_v47 = vsel %vm276_vm6, %v1278_v30, %v1307_v52  ;;  %v281_v29 = vsel %vm276_vm6, %v1307_v52, %v1308_v48  ;;  %v227_v50 = vsel %vm222_vm1, %v1312_v42, %v1313_v31 }
 0x14b   :  { %v1955_v60 = vpop.permute.xlu0 %1325  ;;  %v329_v61 = vpop.permute.xlu1 %328  ;;  %v282_v4 = vsel %vm276_vm6, %v1308_v48, %v1915_v13 }
 0x14c   :  { %v1328_v62 = vunpack.i.h.bf16 %v1955_v60  ;;  %v1327_v63 = vunpack.i.l.bf16 %v1955_v60  ;;  %v336_v54 = vsel %vm330_vm5, %v1303_v18, %v329_v61 }
 0x14d   :  { %v415_v58 = vsel %vm391_vm3, %v336_v54, %v363_v19 }
 0x14e   :  { %v252_v1 = vsel %vm249_vm8, %v1327_v63, %v1328_v62 }
 0x14f   :  { %v400_v2 = vsel %vm391_vm3, %v225_v0, %v252_v1  ;;  %v221_v7 = vpop.permute.xlu2 %220 }
 0x150   :  { %493 = vmatpush.msra.mxu2 %v400_v2  ;;  %v228_v13 = vsel %vm222_vm1, %v1313_v31, %v221_v7 }
 0x153   :  { %v1974_v9 = vpop.permute.xlu0 %1335  ;;  %v1346_v10 = vpop.permute.xlu1 %1345 }
 0x154   :  { %v1338_v51 = vunpack.i.h.bf16 %v1974_v9  ;;  %v1337_v12 = vunpack.i.l.bf16 %v1974_v9  ;;  %v1348_v11 = vunpack.i.h.bf16 %v1346_v10  ;;  %v1347_v17 = vunpack.i.l.bf16 %v1346_v10 }
 0x156   :  { %v250_v32 = vsel %vm249_vm8, %v1347_v17, %v1348_v11  ;;  %v251_v33 = vsel %vm249_vm8, %v1348_v11, %v1327_v63  ;;  %v198_v34 = vsel %vm195_vm9, %v1337_v12, %v1338_v51  ;;  %v197_v44 = vsel %vm195_vm9, %v1353_v6, %v1337_v12 }
 0x157   :  { %v398_v35 = vsel %vm391_vm3, %v223_v24, %v250_v32  ;;  %v399_v36 = vsel %vm391_vm3, %v224_v27, %v251_v33  ;;  %v394_v37 = vsel %vm391_vm3, %v1800_v14, %v198_v34  ;;  %v335_v14 = vsel %vm330_vm5, %v1302_v26, %v1303_v18  ;;  %v127_v24 = vld [vmem:[#allocation2] sm:$0x3f] }
 0x158   :  { %453 = vmatpush.msra.mxu0 %v398_v35  ;;  %473 = vmatpush.msra.mxu1 %v399_v36  ;;  %v393_v25 = vsel %vm391_vm3, %v1820_v21, %v197_v44  ;;  %v414_v56 = vsel %vm391_vm3, %v335_v14, %v362_v46  ;;  %v566_v32 = vperm.slane %v127_v24, 0  ;;  %v568_v45 = vperm.slane %v127_v24, 2 }
 0x159   :  { %494 = vmatpush.msra.mxu2 %v394_v37  ;;  %v569_v54 = vperm.slane %v127_v24, 3 }
 0x15a   :  { %1227 = vmatmul.msk.f32.vlgmr.msra.gmra.mxu2 %vm423_vm10, %v1991_v38  ;;  %454 = vmatpush.msra.mxu0 %v392_v53 }
 0x15b   :  { %474 = vmatpush.msra.mxu1 %v393_v25  ;;  %v1366_v16 = vpop.permute.xlu0 %1365  ;;  %v1361_v26 = vpop.permute.xlu1 %1360  ;;  %1223 = vmatmul.msk.f32.vlgmr.msra.gmra.mxu0 %vm423_vm10, %v1991_v38 }
 0x15c   :  { %1230 = vmatpush.msk.msrb.mxu0 %vm391_vm3, %v389_v5  ;;  %v1368_v21 = vunpack.i.h.bf16 %v1366_v16  ;;  %v1367_v57 = vunpack.i.l.bf16 %v1366_v16  ;;  %v1363_v59 = vunpack.i.h.bf16 %v1361_v26  ;;  %v1362_v61 = vunpack.i.l.bf16 %v1361_v26  ;;  %1225 = vmatmul.msk.f32.vlgmr.msra.gmra.mxu1 %vm423_vm10, %v1991_v38 }
 0x15d   :  { %1232 = vmatpush.msk.msrb.mxu1 %vm391_vm3, %v390_v55  ;;  %v570_v5 = vperm.slane %v127_v24, 4  ;;  %v571_v55 = vperm.slane %v127_v24, 5 }
 0x15e   :  { %531 = vmatpush.msrb.mxu0 %v414_v56  ;;  %v307_v63 = vsel %vm303_vm7, %v1323_v20, %v1362_v61  ;;  %v308_v0 = vsel %vm303_vm7, %v1362_v61, %v1363_v59  ;;  %v253_v1 = vsel %vm249_vm8, %v1328_v62, %v1367_v57  ;;  %v254_v2 = vsel %vm249_vm8, %v1367_v57, %v1368_v21 }
 0x15f   :  { %551 = vmatpush.msrb.mxu1 %v415_v58  ;;  %v407_v3 = vsel %vm391_vm3, %v280_v47, %v307_v63  ;;  %v408_v49 = vsel %vm391_vm3, %v281_v29, %v308_v0  ;;  %v401_v20 = vsel %vm391_vm3, %v1884_v43, %v253_v1  ;;  %v402_v30 = vsel %vm391_vm3, %v227_v50, %v254_v2 }
 0x160   :  { %512 = vmatpush.msra.mxu3 %v407_v3  ;;  %532 = vmatpush.msrb.mxu0 %v408_v49 }
 0x162   :  { %513 = vmatpush.msra.mxu3 %v401_v20  ;;  %533 = vmatpush.msrb.mxu0 %v402_v30 }
 0x163   :  { %v190_v60 = vpop.permute.xlu0 %189  ;;  %v302_v62 = vpop.permute.xlu1 %301 }
 0x164   :  { %v199_v6 = vsel %vm195_vm9, %v1338_v51, %v190_v60  ;;  %v309_v40 = vsel %vm303_vm7, %v1363_v59, %v302_v62 }
 0x165   :  { %v395_v42 = vsel %vm391_vm3, %v1803_v15, %v199_v6  ;;  %v409_v43 = vsel %vm391_vm3, %v282_v4, %v309_v40 }
 0x166   :  { %514 = vmatpush.msra.mxu3 %v395_v42  ;;  %552 = vmatpush.msrb.mxu1 %v409_v43 }
 0x167   :  { %1229 = vmatmul.msk.f32.vlgmr.msra.gmra.mxu3 %vm423_vm10, %v1991_v38 }
 0x16b   :  { %v248_v39 = vpop.permute.xlu0 %247  ;;  %v1371_v41 = vpop.permute.xlu1 %1370 }
 0x16c   :  { %v255_v8 = vsel %vm249_vm8, %v1368_v21, %v248_v39  ;;  %v1373_v9 = vunpack.i.h.bf16 %v1371_v41  ;;  %v1372_v10 = vunpack.i.l.bf16 %v1371_v41 }
 0x16d   :  { %v403_v51 = vsel %vm391_vm3, %v228_v13, %v255_v8 }
 0x16e   :  { %553 = vmatpush.msrb.mxu1 %v403_v51  ;;  %v200_v15 = vsel %vm195_vm9, %v190_v60, %v1372_v10  ;;  %v201_v12 = vsel %vm195_vm9, %v1372_v10, %v1373_v9 }
 0x16f   :  { %v396_v11 = vsel %vm391_vm3, %v1823_v22, %v200_v15  ;;  %v397_v17 = vsel %vm391_vm3, %v1826_v23, %v201_v12  ;;  %v567_v22 = vperm.slane %v127_v24, 1 }
 0x170   :  { %534 = vmatpush.msrb.mxu0 %v396_v11  ;;  %554 = vmatpush.msrb.mxu1 %v397_v17 }
 0x171   :  { %1231 = vmatmul.msk.f32.vlgmr.msrb.gmra.mxu0 %vm423_vm10, %v1991_v38  ;;  %1233 = vmatmul.msk.f32.vlgmr.msrb.gmra.mxu1 %vm423_vm10, %v1991_v38 }
 0x18b   :  { %v421_v18 = vpop.permute.xlu2 %420 }
 0x1d8   :  { %v456_v27 = vpop.f32.mrf.mxu0 }
 0x1d9   :  { %v457_v28 = vadd.f32 %v456_v27, %v421_v18  ;;  %v476_v33 = vpop.f32.mrf.mxu1 }
 0x1da   :  { %v477_v34 = vadd.f32 %v476_v33, %v421_v18 }
 0x1db   :  { %v559_v35 = vmax.f32 %v457_v28, 0.0 }
 0x1dc   :  { %v560_v36 = vmax.f32 %v477_v34, 0.0 }
 0x1dd   :  { %v496_v37 = vpop.f32.mrf.mxu2  ;;  %v578_v23 = vmul.f32 %v566_v32, %v559_v35 }
 0x1de   :  { %v497_v44 = vadd.f32 %v496_v37, %v421_v18  ;;  %v579_v46 = vmul.f32 %v567_v22, %v560_v36 }
 0x1df   :  { %590 = vrot.lane.b32.xlu0 %v578_v23, %s1695_s27 }
 0x1e0   :  { %v561_v48 = vmax.f32 %v497_v44, 0.0 }
 0x1e2   :  { %v580_v52 = vmul.f32 %v568_v45, %v561_v48 }
 0x1e4   :  { %v1375_v38 = vpack.i.bf16 %v580_v52, %v579_v46 }
 0x1e6   :  { %1376 = vrot.lane.b32.xlu1 %v1375_v38, %s1695_s27 }
 0x1ea   :  { %v516_v53 = vpop.f32.mrf.mxu3 }
 0x1eb   :  { %v517_v14 = vadd.f32 %v516_v53, %v421_v18 }
 0x1ed   :  { %v562_v19 = vmax.f32 %v517_v14, 0.0 }
 0x1ee   :  { %v536_v25 = vpop.f32.mrf.mxu0  ;;  %v556_v31 = vpop.f32.mrf.mxu1 }
 0x1ef   :  { %v537_v16 = vadd.f32 %v536_v25, %v421_v18  ;;  %v557_v26 = vadd.f32 %v556_v31, %v421_v18  ;;  %v581_v57 = vmul.f32 %v569_v54, %v562_v19 }
 0x1f1   :  { %v563_v56 = vmax.f32 %v537_v16, 0.0  ;;  %v564_v21 = vmax.f32 %v557_v26, 0.0 }
 0x1f3   :  { %v582_v59 = vmul.f32 %v570_v5, %v563_v56  ;;  %v583_v61 = vmul.f32 %v571_v55, %v564_v21 }
 0x1f5   :  { %600 = vrot.lane.b32.xlu0 %v583_v61, %s1695_s27  ;;  %v1380_v58 = vpack.i.bf16 %v582_v59, %v581_v57 }
 0x1f7   :  { %1381 = vrot.lane.b32.xlu2 %v1380_v58, %s1695_s27 }
 0x251   :  { %v2073_v47 = vpop.permute.xlu0 %590  ;;  %v1382_v3 = vpop.permute.xlu2 %1381 }
 0x252   :  { %v614_v0 = vsel %vm157_vm0, 0.0, %v2073_v47  ;;  %v1383_v50 = vunpack.i.l.bf16 %v1382_v3  ;;  %v1384_v30 = vunpack.i.h.bf16 %v1382_v3 }
 0x254   :  { %v2099_v62 = vsel %vm157_vm0, %v1383_v50, %v1384_v30 }
 0x258   :  { %v1377_v29 = vpop.permute.xlu1 %1376 }
 0x259   :  { %v1378_v63 = vunpack.i.l.bf16 %v1377_v29  ;;  %v1379_v49 = vunpack.i.h.bf16 %v1377_v29 }
 0x25b   :  { %v2079_v1 = vsel %vm157_vm0, %v2073_v47, %v1378_v63  ;;  %v2089_v20 = vsel %vm157_vm0, %v1379_v49, %v1383_v50  ;;  %v2096_v60 = vsel %vm157_vm0, %v1378_v63, %v1379_v49 }
 0x25c   :  { %v1400_v2 = vpack.i.bf16 %v2079_v1, %v614_v0  ;;  %v1425_v4 = vpack.i.bf16 %v2099_v62, %v2096_v60  ;;  %v2205_v0 = vld [vmem:[#allocation8] sm:$0xff] }
 0x25e   :  { %1401 = vrot.lane.b32.xlu0 %v1400_v2, %s1700_s14  ;;  %1391 = vrot.lane.b32.xlu2 %v1400_v2, %s1701_s15 }
 0x25f   :  { %1386 = vrot.lane.b32.xlu1 %v1400_v2, %s1696_s0 }
 0x266   :  { %1416 = vrot.lane.b32.xlu0 %v1400_v2, %s1699_s13  ;;  %1406 = vrot.lane.b32.xlu2 %v1400_v2, %s1698_s12 }
 0x267   :  { %1396 = vrot.lane.b32.xlu1 %v1400_v2, %s1697_s28  ;;  %v601_v6 = vpop.permute.xlu0 %600 }
 0x268   :  { %v2116_v40 = vsel %vm157_vm0, %v1384_v30, %v601_v6  ;;  %v615_v42 = vsel %vm157_vm0, %v601_v6, 0.0 }
 0x269   :  { %v1470_v43 = vpack.i.bf16 %v615_v42, %v2116_v40 }
 0x26e   :  { %780 = vrot.lane.b32.xlu0 %v2089_v20, %s1701_s15  ;;  %1421 = vrot.lane.b32.xlu2 %v1400_v2, %s1703_s16 }
 0x26f   :  { %1411 = vrot.lane.b32.xlu1 %v1400_v2, %s1702_s4 }
 0x276   :  { %1426 = vrot.lane.b32.xlu0 %v1425_v4, %s1696_s0  ;;  %754 = vrot.lane.b32.xlu2 %v2089_v20, %s1697_s28 }
 0x277   :  { %806 = vrot.lane.b32.xlu1 %v2089_v20, %s1696_s0 }
 0x27e   :  { %1441 = vrot.lane.b32.xlu0 %v1425_v4, %s1700_s14  ;;  %1431 = vrot.lane.b32.xlu2 %v1425_v4, %s1701_s15 }
 0x27f   :  { %728 = vrot.lane.b32.xlu1 %v2089_v20, %s1700_s14 }
 0x286   :  { %1456 = vrot.lane.b32.xlu0 %v1425_v4, %s1699_s13  ;;  %1446 = vrot.lane.b32.xlu2 %v1425_v4, %s1698_s12 }
 0x287   :  { %1436 = vrot.lane.b32.xlu1 %v1425_v4, %s1697_s28 }
 0x28e   :  { %1471 = vrot.lane.b32.xlu0 %v1470_v43, %s1701_s15  ;;  %1466 = vrot.lane.b32.xlu2 %v1470_v43, %s1696_s0 }
 0x28f   :  { %1451 = vrot.lane.b32.xlu1 %v1425_v4, %s1702_s4 }
 0x296   :  { %1486 = vrot.lane.b32.xlu0 %v1470_v43, %s1698_s12  ;;  %1481 = vrot.lane.b32.xlu2 %v1470_v43, %s1700_s14 }
 0x297   :  { %1461 = vrot.lane.b32.xlu1 %v1425_v4, %s1703_s16  ;;  %v2216_v4 = vld [vmem:[#allocation8 + $0x8] sm:$0xff] }
 0x29e   :  { %1501 = vrot.lane.b32.xlu0 %v1470_v43, %s1703_s16  ;;  %1491 = vrot.lane.b32.xlu2 %v1470_v43, %s1702_s4 }
 0x29f   :  { %1476 = vrot.lane.b32.xlu1 %v1470_v43, %s1697_s28 }
 0x2a6   :  { %676 = vrot.lane.b32.xlu0 %v2089_v20, %s1702_s4  ;;  %702 = vrot.lane.b32.xlu2 %v2089_v20, %s1698_s12 }
 0x2a7   :  { %1496 = vrot.lane.b32.xlu1 %v1470_v43, %s1699_s13 }
 0x2ae   :  { %624 = vrot.lane.b32.xlu2 %v2089_v20, %s1703_s16 }
 0x2af   :  { %650 = vrot.lane.b32.xlu1 %v2089_v20, %s1699_s13 }
 0x2b8   :  { %v2138_v7 = vpop.permute.xlu2 %1391 }
 0x2b9   :  { %v1394_v10 = vunpack.i.h.bf16 %v2138_v7  ;;  %v1393_v51 = vunpack.i.l.bf16 %v2138_v7 }
 0x2bb   :  { %v788_v17 = vsel %vm357_vm4, %v1393_v51, %v1394_v10 }
 0x2c0   :  { %v2140_v39 = vpop.permute.xlu2 %1406 }
 0x2c1   :  { %v1409_v35 = vunpack.i.h.bf16 %v2140_v39  ;;  %v1408_v22 = vunpack.i.l.bf16 %v2140_v39 }
 0x2c3   :  { %v710_v45 = vsel %vm276_vm6, %v1408_v22, %v1409_v35 }
 0x2c8   :  { %v2142_v41 = vpop.permute.xlu2 %1421 }
 0x2c9   :  { %v1424_v14 = vunpack.i.h.bf16 %v2142_v41  ;;  %v1423_v54 = vunpack.i.l.bf16 %v2142_v41 }
 0x2cb   :  { %v632_v16 = vsel %vm195_vm9, %v1423_v54, %v1424_v14 }
 0x2d0   :  { %v2144_v13 = vpop.permute.xlu2 %754  ;;  %v2146_v8 = vpop.permute.xlu0 %1401 }
 0x2d1   :  { %v1387_v9 = vpop.permute.xlu1 %1386  ;;  %v1404_v28 = vunpack.i.h.bf16 %v2146_v8  ;;  %v1403_v32 = vunpack.i.l.bf16 %v2146_v8 }
 0x2d2   :  { %v1389_v15 = vunpack.i.h.bf16 %v1387_v9  ;;  %v1388_v12 = vunpack.i.l.bf16 %v1387_v9 }
 0x2d3   :  { %v736_v37 = vsel %vm303_vm7, %v1403_v32, %v1404_v28 }
 0x2d4   :  { %v814_v11 = vsel %vm384_vm2, %v1388_v12, %v1389_v15 }
 0x2d5   :  { %854 = vmatpush.msrb.mxu2 %v814_v11 }
 0x2d7   :  { %855 = vmatpush.msrb.mxu2 %v788_v17 }
 0x2d8   :  { %v2152_v18 = vpop.permute.xlu2 %1431  ;;  %v2154_v24 = vpop.permute.xlu0 %1416 }
 0x2d9   :  { %v2156_v27 = vpop.permute.xlu1 %1396  ;;  %v1419_v48 = vunpack.i.h.bf16 %v2154_v24  ;;  %v1418_v52 = vunpack.i.l.bf16 %v2154_v24  ;;  %v1433_v26 = vunpack.i.l.bf16 %v2152_v18  ;;  %v1434_v63 = vunpack.i.h.bf16 %v2152_v18  ;;  %v829_v18 = vld [vmem:[%s2354_s6 + $0x8] sm:$0xff] }
 0x2da   :  { %v1399_v33 = vunpack.i.h.bf16 %v2156_v27  ;;  %v1398_v34 = vunpack.i.l.bf16 %v2156_v27  ;;  %837 = vperm.xlu0 %1505, %v829_v18  }
 0x2db   :  { %v658_v5 = vsel %vm222_vm1, %v1418_v52, %v1419_v48  ;;  %v828_v52 = vld [vmem:[%s2354_s6] sm:$0xff] }
 0x2dc   :  { %v762_v36 = vsel %vm330_vm5, %v1398_v34, %v1399_v33  ;;  %832 = vperm.xlu1 %1506, %v828_v52  }
 0x2dd   :  { %856 = vmatpush.msrb.mxu2 %v762_v36 }
 0x2df   :  { %857 = vmatpush.msrb.mxu2 %v736_v37 }
 0x2e0   :  { %v2170_v23 = vpop.permute.xlu2 %1446  ;;  %v781_v44 = vpop.permute.xlu0 %780 }
 0x2e1   :  { %v2175_v46 = vpop.permute.xlu1 %1411  ;;  %858 = vmatpush.msrb.mxu2 %v710_v45  ;;  %v790_v2 = vsel %vm357_vm4, %v1433_v26, %v781_v44  ;;  %v791_v3 = vsel %vm357_vm4, %v781_v44, %v1434_v63 }
 0x2e2   :  { %v1414_v38 = vunpack.i.h.bf16 %v2175_v46  ;;  %v1413_v53 = vunpack.i.l.bf16 %v2175_v46 }
 0x2e4   :  { %v684_v25 = vsel %vm249_vm8, %v1413_v53, %v1414_v38 }
 0x2e5   :  { %859 = vmatpush.msrb.mxu2 %v684_v25 }
 0x2e7   :  { %860 = vmatpush.msrb.mxu2 %v658_v5 }
 0x2e8   :  { %v2189_v31 = vpop.permute.xlu2 %1466  ;;  %v1427_v19 = vpop.permute.xlu0 %1426 }
 0x2e9   :  { %v807_v55 = vpop.permute.xlu1 %806  ;;  %v1468_v56 = vunpack.i.l.bf16 %v2189_v31  ;;  %v1429_v21 = vunpack.i.h.bf16 %v1427_v19  ;;  %v1428_v57 = vunpack.i.l.bf16 %v1427_v19  ;;  %861 = vmatpush.msrb.mxu2 %v632_v16  ;;  %v1469_v19 = vunpack.i.h.bf16 %v2189_v31 }
 0x2eb   :  { %1235 = vmatpush.msk.msrb.mxu2 %vm1234_vm11, %v2073_v47  ;;  %v815_v59 = vsel %vm384_vm2, %v1389_v15, %v1428_v57  ;;  %v816_v61 = vsel %vm384_vm2, %v1428_v57, %v807_v55  ;;  %v817_v58 = vsel %vm384_vm2, %v807_v55, %v1429_v21  ;;  %v818_v29 = vsel %vm384_vm2, %v1429_v21, %v1468_v56 }
 0x2ec   :  { %877 = vmatpush.msrb.mxu3 %v815_v59  ;;  %900 = vmatpush.msra.mxu0 %v816_v61  ;;  %v789_v47 = vsel %vm357_vm4, %v1394_v10, %v1433_v26  ;;  %v1448_v15 = vunpack.i.l.bf16 %v2170_v23  ;;  %v819_v24 = vsel %vm384_vm2, %v1468_v56, %v1469_v19 }
 0x2ed   :  { %923 = vmatpush.msra.mxu1 %v817_v58  ;;  %946 = vmatpush.msra.mxu2 %v818_v29 }
 0x2ee   :  { %878 = vmatpush.msrb.mxu3 %v789_v47  ;;  %901 = vmatpush.msra.mxu0 %v790_v2  ;;  %v711_v8 = vsel %vm276_vm6, %v1409_v35, %v1448_v15 }
 0x2ef   :  { %924 = vmatpush.msra.mxu1 %v791_v3  ;;  %1236 = vmatmul.msk.f32.vlgmr.msrb.gmra.mxu2 %vm840_vm12, %v2205_v0 }
 0x2f0   :  { %v2212_v49 = vpop.permute.xlu2 %1481  ;;  %v2214_v50 = vpop.permute.xlu0 %1441 }
 0x2f1   :  { %v729_v30 = vpop.permute.xlu1 %728  ;;  %v1443_v7 = vunpack.i.l.bf16 %v2214_v50  ;;  %v1444_v51 = vunpack.i.h.bf16 %v2214_v50  ;;  %v1484_v16 = vunpack.i.h.bf16 %v2212_v49  ;;  %v1483_v41 = vunpack.i.l.bf16 %v2212_v49 }
 0x2f3   :  { %v737_v27 = vsel %vm303_vm7, %v1404_v28, %v1443_v7  ;;  %v738_v32 = vsel %vm303_vm7, %v1443_v7, %v729_v30  ;;  %v740_v29 = vsel %vm303_vm7, %v1444_v51, %v1483_v41 }
 0x2f7   :  { %1237 = vmatmul.msk.f32.gmra.mxu2 %vm840_vm12, %v2216_v4 }
 0x2f8   :  { %v2220_v6 = vpop.permute.xlu2 %1491  ;;  %v2222_v42 = vpop.permute.xlu0 %1456 }
 0x2f9   :  { %v2224_v43 = vpop.permute.xlu1 %1436  ;;  %v1458_v44 = vunpack.i.l.bf16 %v2222_v42  ;;  %v1493_v57 = vunpack.i.l.bf16 %v2220_v6 }
 0x2fa   :  { %v1439_v9 = vunpack.i.h.bf16 %v2224_v43  ;;  %v1438_v10 = vunpack.i.l.bf16 %v2224_v43 }
 0x2fb   :  { %v659_v53 = vsel %vm222_vm1, %v1419_v48, %v1458_v44 }
 0x2fc   :  { %v763_v12 = vsel %vm330_vm5, %v1399_v33, %v1438_v10  ;;  %v764_v11 = vsel %vm330_vm5, %v1438_v10, %v2144_v13  ;;  %v765_v17 = vsel %vm330_vm5, %v2144_v13, %v1439_v9  ;;  %v1449_v33 = vunpack.i.h.bf16 %v2170_v23 }
 0x2fd   :  { %879 = vmatpush.msrb.mxu3 %v763_v12  ;;  %902 = vmatpush.msra.mxu0 %v764_v11  ;;  %v739_v13 = vsel %vm303_vm7, %v729_v30, %v1444_v51  ;;  %v1459_v30 = vunpack.i.h.bf16 %v2222_v42 }
 0x2fe   :  { %925 = vmatpush.msra.mxu1 %v765_v17 }
 0x2ff   :  { %880 = vmatpush.msrb.mxu3 %v737_v27  ;;  %903 = vmatpush.msra.mxu0 %v738_v32 }
 0x300   :  { %926 = vmatpush.msra.mxu1 %v739_v13  ;;  %v703_v34 = vpop.permute.xlu2 %702  ;;  %v1472_v22 = vpop.permute.xlu0 %1471 }
 0x301   :  { %v1452_v36 = vpop.permute.xlu1 %1451  ;;  %v1473_v28 = vunpack.i.l.bf16 %v1472_v22  ;;  %881 = vmatpush.msrb.mxu3 %v711_v8  ;;  %v712_v37 = vsel %vm276_vm6, %v1448_v15, %v703_v34  ;;  %v713_v23 = vsel %vm276_vm6, %v703_v34, %v1449_v33 }
 0x302   :  { %v1453_v45 = vunpack.i.l.bf16 %v1452_v36  ;;  %904 = vmatpush.msra.mxu0 %v712_v37  ;;  %927 = vmatpush.msra.mxu1 %v713_v23  ;;  %v1454_v58 = vunpack.i.h.bf16 %v1452_v36  ;;  %v1004_v23 = vld.sshfl [vmem:[#allocation1] sm:$0xff pattern:$0x73625140] }
 0x303   :  { %v792_v39 = vsel %vm357_vm4, %v1434_v63, %v1473_v28  ;;  %v741_v63 = vsel %vm303_vm7, %v1483_v41, %v1484_v16 }
 0x304   :  { %v685_v35 = vsel %vm249_vm8, %v1414_v38, %v1453_v45  ;;  %947 = vmatpush.msra.mxu2 %v792_v39  ;;  %v1474_v38 = vunpack.i.h.bf16 %v1472_v22  ;;  %v688_v7 = vsel %vm249_vm8, %v1454_v58, %v1493_v57 }
 0x305   :  { %882 = vmatpush.msrb.mxu3 %v685_v35 }
 0x306   :  { %v793_v21 = vsel %vm357_vm4, %v1473_v28, %v1474_v38 }
 0x307   :  { %883 = vmatpush.msrb.mxu3 %v659_v53 }
 0x308   :  { %v1487_v54 = vpop.permute.xlu0 %1486  ;;  %v625_v34 = vpop.permute.xlu2 %624 }
 0x309   :  { %v2269_v25 = vpop.permute.xlu1 %1461  ;;  %v1489_v59 = vunpack.i.h.bf16 %v1487_v54  ;;  %v1488_v31 = vunpack.i.l.bf16 %v1487_v54 }
 0x30a   :  { %v1463_v5 = vunpack.i.l.bf16 %v2269_v25  ;;  %v1464_v12 = vunpack.i.h.bf16 %v2269_v25 }
 0x30b   :  { %v714_v2 = vsel %vm276_vm6, %v1449_v33, %v1488_v31  ;;  %v715_v3 = vsel %vm276_vm6, %v1488_v31, %v1489_v59 }
 0x30c   :  { %v633_v46 = vsel %vm195_vm9, %v1424_v14, %v1463_v5 }
 0x30d   :  { %884 = vmatpush.msrb.mxu3 %v633_v46 }
 0x30f   :  { %885 = vmatpush.msrb.mxu3 %v2079_v1  ;;  %v1494_v1 = vunpack.i.h.bf16 %v2220_v6 }
 0x310   :  { %1238 = vmatmul.msk.f32.vlgmr.msrb.gmra.mxu3 %vm840_vm12, %v2205_v0  ;;  %v1502_v48 = vpop.permute.xlu0 %1501 }
 0x311   :  { %969 = vmatpush.msra.mxu3 %v819_v24  ;;  %v1477_v26 = vpop.permute.xlu1 %1476  ;;  %v689_v49 = vsel %vm249_vm8, %v1493_v57, %v1494_v1  ;;  %v1503_v10 = vunpack.i.l.bf16 %v1502_v48 }
 0x312   :  { %v1479_v55 = vunpack.i.h.bf16 %v1477_v26  ;;  %v1478_v14 = vunpack.i.l.bf16 %v1477_v26 }
 0x313   :  { %970 = vmatpush.msra.mxu3 %v793_v21  ;;  %v636_v18 = vsel %vm195_vm9, %v1464_v12, %v1503_v10 }
 0x314   :  { %v766_v56 = vsel %vm330_vm5, %v1439_v9, %v1478_v14  ;;  %v767_v61 = vsel %vm330_vm5, %v1478_v14, %v1479_v55  ;;  %v1504_v9 = vunpack.i.h.bf16 %v1502_v48 }
 0x315   :  { %948 = vmatpush.msra.mxu2 %v766_v56  ;;  %971 = vmatpush.msra.mxu3 %v767_v61 }
 0x316   :  { %v637_v27 = vsel %vm195_vm9, %v1503_v10, %v1504_v9 }
 0x317   :  { %949 = vmatpush.msra.mxu2 %v740_v29  ;;  %972 = vmatpush.msra.mxu3 %v741_v63 }
 0x318   :  { %1239 = vmatmul.msk.f32.gmra.mxu3 %vm840_vm12, %v2216_v4  ;;  %v677_v47 = vpop.permute.xlu0 %676 }
 0x319   :  { %v1497_v6 = vpop.permute.xlu1 %1496  ;;  %950 = vmatpush.msra.mxu2 %v714_v2  ;;  %973 = vmatpush.msra.mxu3 %v715_v3  ;;  %v686_v50 = vsel %vm249_vm8, %v1453_v45, %v677_v47  ;;  %v687_v43 = vsel %vm249_vm8, %v677_v47, %v1454_v58  ;;  %v1006_v47 = vld.sshfl [vmem:[#allocation1 + $0x10] sm:$0xff pattern:$0x73625140]  ;;  %v1007_v2 = vld.sshfl [vmem:[#allocation1 + $0x18] sm:$0xff pattern:$0x73625140] }
 0x31a   :  { %v1499_v51 = vunpack.i.h.bf16 %v1497_v6  ;;  %v1498_v15 = vunpack.i.l.bf16 %v1497_v6  ;;  %905 = vmatpush.msra.mxu0 %v686_v50  ;;  %928 = vmatpush.msra.mxu1 %v687_v43  ;;  %v1008_v3 = vld.sshfl [vmem:[#allocation1 + $0x20] sm:$0xff pattern:$0x73625140]  ;;  %v1136_v6 = vld [vmem:[#allocation10] sm:$0xff] }
 0x31b   :  { %951 = vmatpush.msra.mxu2 %v688_v7  ;;  %974 = vmatpush.msra.mxu3 %v689_v49  ;;  %v1009_v49 = vld.sshfl [vmem:[#allocation1 + $0x28] sm:$0xff pattern:$0x73625140]  ;;  %v1170_v50 = vld [vmem:[#allocation11 + $0x18] sm:$0xff] }
 0x31c   :  { %v662_v11 = vsel %vm222_vm1, %v1459_v30, %v1498_v15  ;;  %v663_v17 = vsel %vm222_vm1, %v1498_v15, %v1499_v51 }
 0x31d   :  { %952 = vmatpush.msra.mxu2 %v662_v11  ;;  %975 = vmatpush.msra.mxu3 %v663_v17 }
 0x31f   :  { %953 = vmatpush.msra.mxu2 %v636_v18  ;;  %976 = vmatpush.msra.mxu3 %v637_v27 }
 0x321   :  { %v651_v32 = vpop.permute.xlu1 %650  ;;  %954 = vmatpush.msra.mxu2 %v2099_v62  ;;  %977 = vmatpush.msra.mxu3 %v2116_v40  ;;  %v634_v62 = vsel %vm195_vm9, %v1463_v5, %v625_v34  ;;  %v635_v40 = vsel %vm195_vm9, %v625_v34, %v1464_v12  ;;  %v1507_v34 = vld [vmem:[%s2357_s9] ss:$0 sm:$0xff] }
 0x322   :  { %1244 = vmatmul.msk.f32.vlgmr.msra.gmra.mxu2 %vm840_vm12, %v2205_v0  ;;  %1246 = vmatmul.msk.f32.vlgmr.msra.gmra.mxu3 %vm840_vm12, %v2205_v0  ;;  %v660_v33 = vsel %vm222_vm1, %v1458_v44, %v651_v32  ;;  %v661_v13 = vsel %vm222_vm1, %v651_v32, %v1459_v30  ;;  %v1137_v30 = vld [vmem:[#allocation10 + $0x8] sm:$0xff]  ;;  %v1169_v32 = vld [vmem:[#allocation11 + $0x10] sm:$0xff] }
 0x323   :  { %906 = vmatpush.msra.mxu0 %v660_v33  ;;  %929 = vmatpush.msra.mxu1 %v661_v13  ;;  %v1168_v33 = vld [vmem:[#allocation11 + $0x8] sm:$0xff]  ;;  %v1167_v13 = vld [vmem:[#allocation11] sm:$0xff] }
 0x325   :  { %907 = vmatpush.msra.mxu0 %v634_v62  ;;  %930 = vmatpush.msra.mxu1 %v635_v40 }
 0x327   :  { %908 = vmatpush.msra.mxu0 %v2096_v60  ;;  %931 = vmatpush.msra.mxu1 %v2089_v20 }
 0x328   :  { %1240 = vmatmul.msk.f32.vlgmr.msra.gmra.mxu0 %vm840_vm12, %v2205_v0  ;;  %1242 = vmatmul.msk.f32.vlgmr.msra.gmra.mxu1 %vm840_vm12, %v2205_v0 }
 0x32a   :  { %1245 = vmatmul.msk.f32.gmra.mxu2 %vm840_vm12, %v2216_v4  ;;  %1247 = vmatmul.msk.f32.gmra.mxu3 %vm840_vm12, %v2216_v4 }
 0x330   :  { %1241 = vmatmul.msk.f32.gmra.mxu0 %vm840_vm12, %v2216_v4  ;;  %1243 = vmatmul.msk.f32.gmra.mxu1 %vm840_vm12, %v2216_v4  ;;  %v1005_v4 = vld.sshfl [vmem:[#allocation1 + $0x8] sm:$0xff pattern:$0x73625140] }
 0x34c   :  { %v838_v20 = vpop.permute.xlu0 %837 }
 0x34e   :  { %v833_v42 = vpop.permute.xlu1 %832 }
 0x372   :  { %v864_v60 = vpop.f32.mrf.mxu2 }
 0x373   :  { %v865_v36 = vadd.f32 %v864_v60, %v833_v42 }
 0x375   :  { %v985_v0 = vmax.f32 %v865_v36, 0.0 }
 0x37a   :  { %v867_v22 = vpop.f32.mrf.mxu2 }
 0x37b   :  { %v868_v8 = vadd.f32 %v867_v22, %v838_v20 }
 0x37d   :  { %v991_v28 = vmax.f32 %v868_v8, 0.0 }
 0x37f   :  { %1030 = vmatpush.xpose.msrb.mxu0 %v991_v28 }
 0x383   :  { %1031 = vmatpush.xpose.msrb.mxu0 %v985_v0 }
 0x386   :  { %1032 = vmatmul.f32.vlgmr.msrb.gmra.mxu0 %v1004_v23 }
 0x393   :  { %v887_v37 = vpop.f32.mrf.mxu3 }
 0x394   :  { %v888_v39 = vadd.f32 %v887_v37, %v833_v42 }
 0x396   :  { %v986_v35 = vmax.f32 %v888_v39, 0.0 }
 0x39b   :  { %v890_v44 = vpop.f32.mrf.mxu3 }
 0x39c   :  { %v891_v45 = vadd.f32 %v890_v44, %v838_v20 }
 0x39e   :  { %v992_v52 = vmax.f32 %v891_v45, 0.0 }
 0x3a0   :  { %1050 = vmatpush.xpose.msrb.mxu1 %v992_v52 }
 0x3a4   :  { %1051 = vmatpush.xpose.msrb.mxu1 %v986_v35 }
 0x3a5   :  { %v910_v53 = vpop.f32.mrf.mxu0  ;;  %v933_v54 = vpop.f32.mrf.mxu1 }
 0x3a6   :  { %v956_v25 = vpop.f32.mrf.mxu2  ;;  %v979_v5 = vpop.f32.mrf.mxu3  ;;  %v911_v55 = vadd.f32 %v910_v53, %v833_v42  ;;  %v934_v14 = vadd.f32 %v933_v54, %v833_v42 }
 0x3a7   :  { %1052 = vmatmul.f32.vlgmr.msrb.gmra.mxu1 %v1005_v4  ;;  %v957_v57 = vadd.f32 %v956_v25, %v833_v42  ;;  %v980_v59 = vadd.f32 %v979_v5, %v833_v42 }
 0x3a8   :  { %v987_v61 = vmax.f32 %v911_v55, 0.0  ;;  %v988_v58 = vmax.f32 %v934_v14, 0.0 }
 0x3a9   :  { %v989_v29 = vmax.f32 %v957_v57, 0.0  ;;  %v990_v63 = vmax.f32 %v980_v59, 0.0 }
 0x3ad   :  { %v913_v19 = vpop.f32.mrf.mxu0  ;;  %v936_v46 = vpop.f32.mrf.mxu1 }
 0x3ae   :  { %v914_v38 = vadd.f32 %v913_v19, %v838_v20  ;;  %v937_v24 = vadd.f32 %v936_v46, %v838_v20  ;;  %v959_v48 = vpop.f32.mrf.mxu2  ;;  %v982_v16 = vpop.f32.mrf.mxu3 }
 0x3af   :  { %v960_v26 = vadd.f32 %v959_v48, %v838_v20  ;;  %v983_v41 = vadd.f32 %v982_v16, %v838_v20  ;;  %v1508_v20 = vld [vmem:[%s2358_s10] ss:$0 sm:$0xff] }
 0x3b0   :  { %v993_v21 = vmax.f32 %v914_v38, 0.0  ;;  %v994_v1 = vmax.f32 %v937_v24, 0.0 }
 0x3b1   :  { %v995_v31 = vmax.f32 %v960_v26, 0.0  ;;  %v996_v56 = vmax.f32 %v983_v41, 0.0 }
 0x3b2   :  { %1070 = vmatpush.xpose.msra.mxu0 %v993_v21  ;;  %1090 = vmatpush.xpose.msra.mxu1 %v994_v1 }
 0x3b3   :  { %1110 = vmatpush.xpose.msrb.mxu2 %v995_v31  ;;  %1130 = vmatpush.xpose.msrb.mxu3 %v996_v56 }
 0x3b6   :  { %1071 = vmatpush.xpose.msra.mxu0 %v987_v61  ;;  %1091 = vmatpush.xpose.msra.mxu1 %v988_v58 }
 0x3b7   :  { %1111 = vmatpush.xpose.msrb.mxu2 %v989_v29  ;;  %1131 = vmatpush.xpose.msrb.mxu3 %v990_v63 }
 0x3b9   :  { %1072 = vmatmul.f32.vlgmr.msra.gmra.mxu0 %v1006_v47  ;;  %1092 = vmatmul.f32.vlgmr.msra.gmra.mxu1 %v1007_v2 }
 0x3ba   :  { %1112 = vmatmul.f32.vlgmr.msrb.gmra.mxu2 %v1008_v3  ;;  %1132 = vmatmul.f32.vlgmr.msrb.gmra.mxu3 %v1009_v49 }
 0x3bb   :  { %1160 = vmatpush.msrb.mxu0 %v1137_v30  ;;  %1191 = vmatpush.msrb.mxu1 %v1170_v50 }
 0x3bd   :  { %1161 = vmatpush.msrb.mxu0 %v1136_v6  ;;  %1192 = vmatpush.msrb.mxu1 %v1169_v32 }
 0x3bf   :  { %1193 = vmatpush.msrb.mxu1 %v1168_v33 }
 0x3c1   :  { %1194 = vmatpush.msrb.mxu1 %v1167_v13 }
 0x403   :  { %v1033_v43 = vpop.f32.mrf.mxu0 }
 0x424   :  { %v1053_v7 = vpop.f32.mrf.mxu1 }
 0x425   :  { %v1054_v9 = vadd.f32 %v1053_v7, %v1033_v43 }
 0x436   :  { %v1073_v10 = vpop.f32.mrf.mxu0  ;;  %v1093_v15 = vpop.f32.mrf.mxu1 }
 0x437   :  { %v1074_v51 = vadd.f32 %v1073_v10, %v1054_v9 }
 0x439   :  { %v1094_v12 = vadd.f32 %v1093_v15, %v1074_v51 }
 0x43d   :  { %v1113_v11 = vpop.f32.mrf.mxu2  ;;  %v1133_v17 = vpop.f32.mrf.mxu3 }
 0x43e   :  { %v1114_v18 = vadd.f32 %v1113_v11, %v1094_v12 }
 0x440   :  { %v1134_v27 = vadd.f32 %v1133_v17, %v1114_v18 }
 0x442   :  { %1248 = vmatmul.msk.f32.vlgmr.msrb.gmra.mxu0 %vm1142_vm13, %v1134_v27 }
 0x4bf   :  { %v1163_v62 = vpop.f32.mrf.mxu0 }
 0x4c0   :  { %v1164_v40 = vadd.f32 %v1507_v34, %v1163_v62 }
 0x4c2   :  { %v1166_v60 = vmax.f32 %v1164_v40, 0.0 }
 0x4c4   :  { %1249 = vmatmul.msk.f32.vlgmr.msrb.gmra.mxu1 %vm1175_vm14, %v1166_v60 }
 0x541   :  { %v1196_v42 = vpop.f32.mrf.mxu1 }
 0x542   :  { %v1197_v22 = vadd.f32 %v1508_v20, %v1196_v42 }
 0x544   :  { %v1199_v8 = vmax.f32 %v1197_v22, 0.0 }
 0x546   :  { %1201 = vst.msk [vmem:[#allocation13] sm:$0x3] %vm1200_vm15, %v1199_v8 }
 0x547   :  { %1212 = dma.vmem_to_hbm [thread:$0]  %s1208_s3, 32, %s1210_s26, [#allocation4]  }
 0x548   :  { %1685 = dma.done.wait [#allocation4], 32  }
 0x549   :  { %1686 = vsyncadd [#allocation4], 4294967264 }
 0x54a   :  { %1217 = vsyncpa [#allocation3], 1 }
 0x54b   :  { %1218 = vsyncpa [#allocation6], 1 }
 0x54c   :  { %1219 = vsyncpa [#allocation9], 1 }
 0x54d   :  { %1220 = vsyncpa [#allocation12], 1 }
 0x54e   :  { %1221 = vsyncpa [#allocation4], 1 }

</bundles_post_ra>
